<compile_context>
chip_gen: v7x
topology: tpu7x:2x2x1
jax: 0.10.0
libtpu: 0.0.40
codegen_flags: <defaults>
</compile_context>

<pallas_src>
import functools

import jax
import jax.numpy as jnp
from jax.experimental import pallas as pl
from jax.experimental.pallas import tpu as pltpu


def _round_up(x: int, m: int) -> int:
    return (x + m - 1) // m * m


def _attention_kernel(x_ref, w_ref, logit_ref, norm_ref, *, d_actual: int):
    # x_ref: (TB, F) bf16, w_ref: (F, Dp) bf16, outputs: (TB, Dp) f32
    x = x_ref[...]
    w = w_ref[...]
    # MXU matmul with f32 accumulation.
    logits = jnp.dot(x, w, preferred_element_type=jnp.float32)
    logit_ref[...] = logits

    dp = logits.shape[-1]
    if d_actual < dp:
        # Padded columns must not contribute to the softmax denominator.
        col = jax.lax.broadcasted_iota(jnp.int32, logits.shape, 1)
        logits = jnp.where(col < d_actual, logits, -jnp.inf)

    # Numerically-stable softmax along dim=1 (VPU reductions + EUP exp/recip).
    m = jnp.max(logits, axis=-1, keepdims=True)
    e = jnp.exp(logits - m)
    denom = jnp.sum(e, axis=-1, keepdims=True)
    norm_ref[...] = e * pl.reciprocal(denom, approx=True)


def _pick_tile_b(B: int, F: int, Dp: int) -> int:
    """Rows per grid step, sized to stay well under v7x's 32 MiB scoped VMEM."""
    budget = 24 * 1024 * 1024                      # headroom under 32 MiB default
    w_bytes = F * Dp * 2                           # bf16 W, resident once
    per_row = 2 * F * 2 + 2 * 2 * Dp * 4           # 2x-buffered bf16 x + two 2x-buffered f32 outs
    tb = max(16, (budget - w_bytes) // per_row)
    tb = max(16, min(1024, int(tb)) // 16 * 16)    # multiple of 16 (bf16 sublane packing)
    tb = min(tb, _round_up(B, 16))                 # don't over-pad tiny batches
    return tb


def attention_forward(x, W):
    """x: arbitrary-rank array with leading batch dim; W: (feature_dim, domain_num)."""
    B = x.shape[0]
    x2d = x.reshape(B, -1).astype(jnp.bfloat16)    # flatten like torch .view(B, -1)
    F = x2d.shape[1]
    D = W.shape[1]
    assert W.shape[0] == F, "feature_dim mismatch"

    # Lane-dense output width: pad domain dim up to a multiple of 128.
    Dp = _round_up(max(D, 128), 128)
    w_bf16 = W.astype(jnp.bfloat16)
    if Dp > D:
        w_bf16 = jnp.pad(w_bf16, ((0, 0), (0, Dp - D)))

    # Tile the batch dim; pad B to a multiple of the tile.
    TB = _pick_tile_b(B, F, Dp)
    Bp = _round_up(B, TB)
    if Bp > B:
        x2d = jnp.pad(x2d, ((0, Bp - B), (0, 0)))

    grid = (Bp // TB,)
    kernel = functools.partial(_attention_kernel, d_actual=D)

    out_shapes = (
        jax.ShapeDtypeStruct((Bp, Dp), jnp.float32),   # attention_logit (padded)
        jax.ShapeDtypeStruct((Bp, Dp), jnp.float32),   # normalized_attention (padded)
    )
    cost = pl.CostEstimate(
        flops=2 * Bp * F * Dp,
        transcendentals=Bp * Dp,
        bytes_accessed=Bp * F * 2 + F * Dp * 2 + 2 * Bp * Dp * 4,
    )

    fn = pl.pallas_call(
        kernel,
        out_shape=out_shapes,
        grid=grid,
        in_specs=[
            pl.BlockSpec((TB, F), lambda i: (i, 0)),   # x tile, streamed over batch
            pl.BlockSpec((F, Dp), lambda i: (0, 0)),   # W, resident across all steps
        ],
        out_specs=(
            pl.BlockSpec((TB, Dp), lambda i: (i, 0)),
            pl.BlockSpec((TB, Dp), lambda i: (i, 0)),
        ),
        compiler_params=pltpu.CompilerParams(dimension_semantics=("parallel",)),
        cost_estimate=cost,
    )
    logits_p, norm_p = fn(x2d, w_bf16)
    # Slice padded batch rows / padded domain columns back off.
    return logits_p[:B, :D], norm_p[:B, :D]


if __name__ == "__main__":
    key = jax.random.PRNGKey(0)
    kx, kw = jax.random.split(key)

    # Small shapes consistent with the module's forward:
    # x: (batch=2, channels=4, 16, 16) -> feature_dim = 1024
    batch, C, H, Wsp = 2, 4, 16, 16
    feature_dim = C * H * Wsp
    domain_num = 8

    x = jax.random.normal(kx, (batch, C, H, Wsp), dtype=jnp.float32)
    # torch.FloatTensor(feature_dim, domain_num).uniform_(-0.1, 0.1)
    W = jax.random.uniform(kw, (feature_dim, domain_num),
                           minval=-0.1, maxval=0.1, dtype=jnp.float32)

    logits, normalized = attention_forward(x, W)
    jax.block_until_ready((logits, normalized))

    # sanity: reference in plain JAX (same bf16 input rounding as the kernel)
    x2d = x.reshape(batch, -1)
    xb = x2d.astype(jnp.bfloat16).astype(jnp.float32)
    Wb = W.astype(jnp.bfloat16).astype(jnp.float32)
    ref_logits = xb @ Wb
    ref_norm = jax.nn.softmax(ref_logits, axis=1)

    assert logits.shape == (batch, domain_num)
    assert normalized.shape == (batch, domain_num)
    assert jnp.allclose(logits, ref_logits, atol=3e-3, rtol=3e-3)
    assert jnp.allclose(normalized, ref_norm, atol=1e-2, rtol=1e-2)
    assert jnp.allclose(jnp.sum(normalized, axis=1), 1.0, atol=1e-2)

    print("KERNEL_OK")
</pallas_src>

<mosaic_0001>
module attributes {stable_mosaic.version = 11 : i64} {
  func.func @_attention_kernel(%arg0: i32, %arg1: memref<16x1024xbf16, #tpu.memory_space<vmem>>, %arg2: memref<1024x128xbf16, #tpu.memory_space<vmem>>, %arg3: memref<16x128xf32, #tpu.memory_space<vmem>>, %arg4: memref<16x128xf32, #tpu.memory_space<vmem>>) attributes {dimension_semantics = [#tpu.dimension_semantics<parallel>], iteration_bounds = array<i64: 1>, scalar_prefetch = 0 : i64, scratch_operands = 0 : i64, tpu.core_type = #tpu.core_type<tc>, window_params = [{transform_indices = @transform_0, window_bounds = array<i64: 16, 1024>}, {pipeline_mode = #tpu.pipeline_mode<synchronous>, transform_indices = @transform_1, window_bounds = array<i64: 1024, 128>}, {transform_indices = @transform_2, window_bounds = array<i64: 16, 128>}, {transform_indices = @transform_3, window_bounds = array<i64: 16, 128>}]} {
    %c0 = arith.constant 0 : index
    %c0_0 = arith.constant 0 : index
    %0 = vector.load %arg1[%c0, %c0_0] : memref<16x1024xbf16, #tpu.memory_space<vmem>>, vector<16x1024xbf16>
    %c0_1 = arith.constant 0 : index
    %c0_2 = arith.constant 0 : index
    %1 = vector.load %arg2[%c0_1, %c0_2] : memref<1024x128xbf16, #tpu.memory_space<vmem>>, vector<1024x128xbf16>
    %cst = arith.constant dense<0.000000e+00> : vector<16x128xf32>
    %2 = tpu.matmul %0, %1, %cst {dimension_numbers = #tpu.dot_dimension_numbers<[1], [0], [0], [1], [0, 0, 1, 1], [], []>} : vector<16x1024xbf16>, vector<1024x128xbf16>, vector<16x128xf32> -> vector<16x128xf32>
    %c0_3 = arith.constant 0 : index
    %c0_4 = arith.constant 0 : index
    %3 = vector.load %arg3[%c0_3, %c0_4] : memref<16x128xf32, #tpu.memory_space<vmem>>, vector<16x128xf32>
    tpu.vector_store %arg3[%c0_3, %c0_4], %2 {strides = array<i32>} : memref<16x128xf32, #tpu.memory_space<vmem>>, vector<16x128xf32>,
    %4 = tpu.iota {dimensions = array<i32: 1>} : vector<16x128xi32>
    %c8_i32 = arith.constant 8 : i32
    %5 = vector.broadcast %c8_i32 : i32 to vector<16x128xi32>
    %6 = arith.cmpi slt, %4, %5 : vector<16x128xi32>
    %cst_5 = arith.constant 0xFF800000 : f32
    %7 = vector.broadcast %cst_5 : f32 to vector<16x128xf32>
    %8 = arith.select %6, %2, %7 : vector<16x128xi1>, vector<16x128xf32>
    %cst_6 = arith.constant dense<0xFF800000> : vector<16xf32>
    %9 = vector.multi_reduction <maximumf>, %8, %cst_6 [1] : vector<16x128xf32> to vector<16xf32>
    %10 = vector.shape_cast %9 : vector<16xf32> to vector<16x1xf32>
    %11 = vector.broadcast %10 : vector<16x1xf32> to vector<16x128xf32>
    %12 = arith.subf %8, %11 : vector<16x128xf32>
    %13 = math.exp %12 : vector<16x128xf32>
    %cst_7 = arith.constant dense<0.000000e+00> : vector<16xf32>
    %14 = vector.multi_reduction <add>, %13, %cst_7 [1] : vector<16x128xf32> to vector<16xf32>
    %15 = vector.shape_cast %14 : vector<16xf32> to vector<16x1xf32>
    %16 = tpu.reciprocal %15 {approx = true} : vector<16x1xf32> -> vector<16x1xf32>
    %17 = vector.broadcast %16 : vector<16x1xf32> to vector<16x128xf32>
    %18 = arith.mulf %13, %17 : vector<16x128xf32>
    %c0_8 = arith.constant 0 : index
    %c0_9 = arith.constant 0 : index
    %19 = vector.load %arg4[%c0_8, %c0_9] : memref<16x128xf32, #tpu.memory_space<vmem>>, vector<16x128xf32>
    tpu.vector_store %arg4[%c0_8, %c0_9], %18 {strides = array<i32>} : memref<16x128xf32, #tpu.memory_space<vmem>>, vector<16x128xf32>,
    return
  }
  func.func @transform_0(%arg0: i32) -> (i32, i32) {
    %c0_i32 = arith.constant 0 : i32
    %c0_i32_0 = arith.constant 0 : i32
    return %arg0, %c0_i32 : i32, i32
  }
  func.func @transform_1(%arg0: i32) -> (i32, i32) {
    %c0_i32 = arith.constant 0 : i32
    %c0_i32_0 = arith.constant 0 : i32
    %c0_i32_1 = arith.constant 0 : i32
    return %c0_i32, %c0_i32_0 : i32, i32
  }
  func.func @transform_2(%arg0: i32) -> (i32, i32) {
    %c0_i32 = arith.constant 0 : i32
    %c0_i32_0 = arith.constant 0 : i32
    return %arg0, %c0_i32 : i32, i32
  }
  func.func @transform_3(%arg0: i32) -> (i32, i32) {
    %c0_i32 = arith.constant 0 : i32
    %c0_i32_0 = arith.constant 0 : i32
    return %arg0, %c0_i32 : i32, i32
  }
}

</mosaic_0001>

<bundles_post_ra>
// kernel: tpu_custom_call.1
= control target key start
LH: loop header
LB: loop body
LE: loop exit
PB: predicated region body
PF: predicated region fallthrough
CT: control target
= control target key end

     0   :  { %9 = vsyncpa [#allocation3], 0  ;;  %s1251_s0 = inlined_call_operand.hbm [shape: bf16[16,1024], index: 0, kind: input, shape index: {}]   ;;  %s1252_s1 = inlined_call_operand.hbm [shape: bf16[1024,128], index: 1, kind: input, shape index: {}]   ;;  %s1253_s2 = inlined_call_operand.hbm [shape: f32[16,128], index: 2, kind: output, shape index: {0}]   ;;  %s1254_s3 = inlined_call_operand.hbm [shape: f32[16,128], index: 3, kind: output, shape index: {1}]  }
   0x1   :  { %10 = vsyncpa [#allocation6], 0 }
   0x2   :  { %11 = vsyncpa [#allocation4], 0 }
   0x3   :  { %12 = vsyncpa [#allocation9], 0  ;;  %s1167_s12 = smov [#allocation2]   ;;  %s1071_s16 = scalar_lea.hbm %s1251_s0, 1024 }
   0x4   :  { %s18_s13 = sshll.u32 %s1167_s12, 4  ;;  %p1072_p0 = scmp.ne.s32.totalorder %s1251_s0, %s1071_s16  ;;  %s19_s13 = int_to_ptr.vmem [resolvable:$true] %s18_s13 }
   0x5   :  { %p1075_p1 = scmp.lt.u32.totalorder %s1071_s16, %s1251_s0 }
   0x7   :  { %p1077_p2 = pnand %p1075_p1, %p1072_p0 }
   0x9   :  { %1080 = shalt.err (!%p1077_p2)
}
   0xa   :  { %s1081_s21 = scalar_lea.vmem %s19_s13, 1024  ;;  %p1086_p4 = scmp.lt.s32.totalorder %s19_s13, %s19_s13 }
   0xb   :  { %p1082_p3 = scmp.ne.s32.totalorder %s19_s13, %s1081_s21  ;;  %p1087_p5 = scmp.lt.s32.totalorder %s1081_s21, %s1081_s21 }
   0xd   :  { %p1088_p6 = por %p1087_p5, %p1086_p4 }
   0xf   :  { %p1089_p7 = pnand %p1088_p6, %p1082_p3 }
  0x11   :  { %1092 = shalt.err (!%p1089_p7)
}
  0x12   :  { %s1168_s22 = smov 512   ;;  %s1169_s23 = smov 32  }
  0x13   :  { %24 = dma.hbm_to_vmem [thread:$0]  %s1251_s0, 1024, %s19_s13, [#allocation3], %s1168_s22, %s1168_s22, %s1169_s23  }
  0x14   :  { %s1170_s26 = smov [#allocation5]   ;;  %s1093_s30 = scalar_lea.hbm %s1252_s1, 8192 }
  0x15   :  { %s30_s27 = sshll.u32 %s1170_s26, 4  ;;  %p1094_p8 = scmp.ne.s32.totalorder %s1252_s1, %s1093_s30  ;;  %s31_s27 = int_to_ptr.vmem [resolvable:$true] %s30_s27 }
  0x16   :  { %p1097_p9 = scmp.lt.u32.totalorder %s1093_s30, %s1252_s1 }
  0x18   :  { %p1099_p10 = pnand %p1097_p9, %p1094_p8 }
  0x1a   :  { %1102 = shalt.err (!%p1099_p10)
}
  0x1b   :  { %s1103_s8 = scalar_lea.vmem %s31_s27, 8192  ;;  %p1108_p12 = scmp.lt.s32.totalorder %s31_s27, %s31_s27 }
  0x1c   :  { %p1104_p11 = scmp.ne.s32.totalorder %s31_s27, %s1103_s8  ;;  %p1109_p13 = scmp.lt.s32.totalorder %s1103_s8, %s1103_s8 }
  0x1e   :  { %p1110_p0 = por %p1109_p13, %p1108_p12 }
  0x20   :  { %p1111_p1 = pnand %p1110_p0, %p1104_p11 }
  0x22   :  { %1114 = shalt.err (!%p1111_p1)
}
  0x23   :  { %s1171_s0 = smov 64   ;;  %s1172_s9 = smov 4  }
  0x24   :  { %36 = dma.hbm_to_vmem [thread:$0]  %s1252_s1, 8192, %s31_s27, [#allocation6], %s1171_s0, %s1171_s0, %s1172_s9  }
  0x25   :  { %1159 = dma.done.wait [#allocation3], 1024  }
  0x26   :  { %1160 = vsyncadd [#allocation3], 4294966272 }
  0x27   :  { %1161 = dma.done.wait [#allocation6], 8192  }
  0x28   :  { %1162 = vsyncadd [#allocation6], 4294959104  ;;  %v999_v0 = vld [vmem:[#allocation5 + $0x40] sm:$0xff]   ;;  %v1003_v4 = vld [vmem:[#allocation5 + $0x48] sm:$0xff]   ;;  %s1173_s1 = smov [#allocation7]  }
  0x29   :  { %v1000_v1 = vld [vmem:[#allocation5 + $0xc0] sm:$0xff]   ;;  %901 = vmatprep.subr.bf16.mxu0 %v999_v0  ;;  %v1004_v5 = vld [vmem:[#allocation5 + $0xc8] sm:$0xff]   ;;  %v1007_v8 = vld [vmem:[#allocation5 + $0x50] sm:$0xff]   ;;  %s800_s12 = sshll.u32 %s1173_s1, 4  ;;  %s801_s12 = int_to_ptr.vmem [resolvable:$true] %s800_s12 }
  0x2a   :  { %v1001_v2 = vld [vmem:[#allocation5] sm:$0xff]   ;;  %923 = vmatprep.subr.bf16.mxu1 %v1000_v1  ;;  %v1005_v6 = vld [vmem:[#allocation5 + $0x8] sm:$0xff]   ;;  %v1008_v9 = vld [vmem:[#allocation5 + $0xd0] sm:$0xff]   ;;  %s1115_s13 = scalar_lea.vmem %s801_s12, 256  ;;  %p1120_p3 = scmp.lt.s32.totalorder %s801_s12, %s801_s12 }
  0x2b   :  { %v1002_v3 = vld [vmem:[#allocation5 + $0x80] sm:$0xff]   ;;  %902 = vmatpush3.bf16.msra.mxu0 %v1001_v2  ;;  %v1006_v7 = vld [vmem:[#allocation5 + $0x88] sm:$0xff]   ;;  %v1009_v10 = vld [vmem:[#allocation5 + $0x10] sm:$0xff]   ;;  %p1116_p2 = scmp.ne.s32.totalorder %s801_s12, %s1115_s13  ;;  %p1121_p4 = scmp.lt.s32.totalorder %s1115_s13, %s1115_s13 }
  0x2c   :  { %924 = vmatpush3.bf16.msra.mxu1 %v1002_v3  ;;  %903 = vmatprep.subr.bf16.mxu0 %v1003_v4  ;;  %v1010_v11 = vld [vmem:[#allocation5 + $0x90] sm:$0xff]   ;;  %v1011_v12 = vld [vmem:[#allocation5 + $0x58] sm:$0xff]   ;;  %v1015_v16 = vld [vmem:[#allocation5 + $0x60] sm:$0xff]  }
  0x2d   :  { %925 = vmatprep.subr.bf16.mxu1 %v1004_v5  ;;  %v1012_v13 = vld [vmem:[#allocation5 + $0xd8] sm:$0xff]   ;;  %v1016_v17 = vld [vmem:[#allocation5 + $0xe0] sm:$0xff]   ;;  %v1019_v20 = vld [vmem:[#allocation5 + $0x68] sm:$0xff]   ;;  %p1122_p5 = por %p1121_p4, %p1120_p3 }
  0x2e   :  { %v1013_v14 = vld [vmem:[#allocation5 + $0x18] sm:$0xff]   ;;  %v1017_v18 = vld [vmem:[#allocation5 + $0x20] sm:$0xff]   ;;  %v1020_v21 = vld [vmem:[#allocation5 + $0xe8] sm:$0xff]  }
  0x2f   :  { %904 = vmatpush3.bf16.msra.mxu0 %v1005_v6  ;;  %v1014_v15 = vld [vmem:[#allocation5 + $0x98] sm:$0xff]   ;;  %v1018_v19 = vld [vmem:[#allocation5 + $0xa0] sm:$0xff]   ;;  %v1021_v22 = vld [vmem:[#allocation5 + $0x28] sm:$0xff]   ;;  %p1123_p6 = pnand %p1122_p5, %p1116_p2 }
  0x30   :  { %926 = vmatpush3.bf16.msra.mxu1 %v1006_v7  ;;  %905 = vmatprep.subr.bf16.mxu0 %v1007_v8  ;;  %v1022_v23 = vld [vmem:[#allocation5 + $0xa8] sm:$0xff]   ;;  %v1023_v24 = vld [vmem:[#allocation5 + $0x70] sm:$0xff]   ;;  %v1027_v28 = vld [vmem:[#allocation5 + $0x78] sm:$0xff]  }
  0x31   :  { %927 = vmatprep.subr.bf16.mxu1 %v1008_v9  ;;  %v1024_v25 = vld [vmem:[#allocation5 + $0xf0] sm:$0xff]   ;;  %v1028_v29 = vld [vmem:[#allocation5 + $0xf8] sm:$0xff]   ;;  %v44_v32 = vld [vmem:[#allocation2] sm:$0xff] }
  0x32   :  { %v1025_v26 = vld [vmem:[#allocation5 + $0x30] sm:$0xff]   ;;  %v1029_v30 = vld [vmem:[#allocation5 + $0x38] sm:$0xff]   ;;  %v48_v33 = vld [vmem:[#allocation2 + $0x20] sm:$0xff] }
  0x33   :  { %906 = vmatpush3.bf16.msra.mxu0 %v1009_v10  ;;  %v1026_v27 = vld [vmem:[#allocation5 + $0xb0] sm:$0xff]   ;;  %v1030_v31 = vld [vmem:[#allocation5 + $0xb8] sm:$0xff]   ;;  %v45_v34 = vld [vmem:[#allocation2 + $0x8] sm:$0xff]  ;;  %v829_v35 = vcombine.low %v44_v32, %v48_v33  ;;  %v830_v36 = vcombine.high %v44_v32, %v48_v33 }
  0x34   :  { %928 = vmatpush3.bf16.msra.mxu1 %v1010_v11  ;;  %907 = vmatprep.subr.bf16.mxu0 %v1011_v12  ;;  %v49_v37 = vld [vmem:[#allocation2 + $0x28] sm:$0xff]  ;;  %v1031_v40 = vld [vmem:[#allocation5 + $0x140] sm:$0xff]   ;;  %v1039_v48 = vld [vmem:[#allocation5 + $0x150] sm:$0xff]  }
  0x35   :  { %929 = vmatprep.subr.bf16.mxu1 %v1012_v13  ;;  %v831_v38 = vcombine.low %v45_v34, %v49_v37  ;;  %v832_v39 = vcombine.high %v45_v34, %v49_v37  ;;  %636 = vmatprep.mubr.bf16.mxu0 %v830_v36  ;;  %v1032_v41 = vld [vmem:[#allocation5 + $0x1c0] sm:$0xff]   ;;  %v1035_v44 = vld [vmem:[#allocation5 + $0x148] sm:$0xff]   ;;  %v1040_v49 = vld [vmem:[#allocation5 + $0x1d0] sm:$0xff]  }
  0x36   :  { %v1033_v42 = vld [vmem:[#allocation5 + $0x100] sm:$0xff]   ;;  %v1036_v45 = vld [vmem:[#allocation5 + $0x1c8] sm:$0xff]   ;;  %v1041_v50 = vld [vmem:[#allocation5 + $0x110] sm:$0xff]  }
  0x37   :  { %908 = vmatpush3.bf16.msra.mxu0 %v1013_v14  ;;  %677 = vmatprep.mubr.bf16.mxu1 %v832_v39  ;;  %v1034_v43 = vld [vmem:[#allocation5 + $0x180] sm:$0xff]   ;;  %v1037_v46 = vld [vmem:[#allocation5 + $0x108] sm:$0xff]   ;;  %v1042_v51 = vld [vmem:[#allocation5 + $0x190] sm:$0xff]  }
  0x38   :  { %930 = vmatpush3.bf16.msra.mxu1 %v1014_v15  ;;  %909 = vmatprep.subr.bf16.mxu0 %v1015_v16  ;;  %v1038_v47 = vld [vmem:[#allocation5 + $0x188] sm:$0xff]   ;;  %v1043_v52 = vld [vmem:[#allocation5 + $0x158] sm:$0xff]   ;;  %v1047_v56 = vld [vmem:[#allocation5 + $0x160] sm:$0xff]  }
  0x39   :  { %931 = vmatprep.subr.bf16.mxu1 %v1016_v17  ;;  %v1044_v53 = vld [vmem:[#allocation5 + $0x1d8] sm:$0xff]   ;;  %v1048_v57 = vld [vmem:[#allocation5 + $0x1e0] sm:$0xff]   ;;  %v1051_v60 = vld [vmem:[#allocation5 + $0x168] sm:$0xff]  }
  0x3a   :  { %v1045_v54 = vld [vmem:[#allocation5 + $0x118] sm:$0xff]   ;;  %v1049_v58 = vld [vmem:[#allocation5 + $0x120] sm:$0xff]   ;;  %v1052_v61 = vld [vmem:[#allocation5 + $0x1e8] sm:$0xff]  }
  0x3b   :  { %910 = vmatpush3.bf16.msra.mxu0 %v1017_v18  ;;  %v1046_v55 = vld [vmem:[#allocation5 + $0x198] sm:$0xff]   ;;  %v1050_v59 = vld [vmem:[#allocation5 + $0x1a0] sm:$0xff]   ;;  %v1053_v62 = vld [vmem:[#allocation5 + $0x128] sm:$0xff]  }
  0x3c   :  { %932 = vmatpush3.bf16.msra.mxu1 %v1018_v19  ;;  %911 = vmatprep.subr.bf16.mxu0 %v1019_v20  ;;  %v1054_v63 = vld [vmem:[#allocation5 + $0x1a8] sm:$0xff]   ;;  %v1055_v0 = vld [vmem:[#allocation5 + $0x170] sm:$0xff]   ;;  %v1059_v4 = vld [vmem:[#allocation5 + $0x178] sm:$0xff]  }
  0x3d   :  { %933 = vmatprep.subr.bf16.mxu1 %v1020_v21  ;;  %v1056_v1 = vld [vmem:[#allocation5 + $0x1f0] sm:$0xff]   ;;  %v1060_v5 = vld [vmem:[#allocation5 + $0x1f8] sm:$0xff]  }
  0x3e   :  { %v1057_v2 = vld [vmem:[#allocation5 + $0x130] sm:$0xff]   ;;  %v1061_v6 = vld [vmem:[#allocation5 + $0x138] sm:$0xff]  }
  0x3f   :  { %912 = vmatpush3.bf16.msra.mxu0 %v1021_v22  ;;  %v1058_v3 = vld [vmem:[#allocation5 + $0x1b0] sm:$0xff]   ;;  %v1062_v7 = vld [vmem:[#allocation5 + $0x1b8] sm:$0xff]  }
  0x40   :  { %934 = vmatpush3.bf16.msra.mxu1 %v1022_v23  ;;  %913 = vmatprep.subr.bf16.mxu0 %v1023_v24  ;;  %v46_v8 = vld [vmem:[#allocation2 + $0x10] sm:$0xff]  ;;  %v47_v12 = vld [vmem:[#allocation2 + $0x18] sm:$0xff] }
  0x41   :  { %935 = vmatprep.subr.bf16.mxu1 %v1024_v25  ;;  %v50_v9 = vld [vmem:[#allocation2 + $0x30] sm:$0xff]  ;;  %v51_v13 = vld [vmem:[#allocation2 + $0x38] sm:$0xff] }
  0x42   :  { %v833_v10 = vcombine.low %v46_v8, %v50_v9  ;;  %v834_v11 = vcombine.high %v46_v8, %v50_v9  ;;  %v835_v14 = vcombine.low %v47_v12, %v51_v13  ;;  %v836_v15 = vcombine.high %v47_v12, %v51_v13 }
  0x43   :  { %914 = vmatpush3.bf16.msra.mxu0 %v1025_v26 }
  0x44   :  { %936 = vmatpush3.bf16.msra.mxu1 %v1026_v27  ;;  %915 = vmatprep.subr.bf16.mxu0 %v1027_v28 }
  0x45   :  { %937 = vmatprep.subr.bf16.mxu1 %v1028_v29 }
  0x47   :  { %916 = vmatpush3.bf16.msra.mxu0 %v1029_v30  ;;  %v770_v30 = vlaneseq }
  0x48   :  { %938 = vmatpush3.bf16.msra.mxu1 %v1030_v31  ;;  %945 = vmatprep.subr.bf16.mxu0 %v1031_v40 }
  0x49   :  { %967 = vmatprep.subr.bf16.mxu1 %v1032_v41  ;;  %v771_v34 = vand.u32 127, %v770_v30 }
  0x4a   :  { %637 = vmatmul.mubr.bf16.vlgmr.msra.gmra.mrb[0].mxu0 %v829_v35 }
  0x4b   :  { %678 = vmatmul.mubr.bf16.vlgmr.msra.gmra.mrb[0].mxu1 %v831_v38  ;;  %946 = vmatpush3.bf16.msra.mxu0 %v1033_v42  ;;  %vm772_vm0 = vcmp.lt.s32.totalorder %v771_v34, 8 }
  0x4c   :  { %968 = vmatpush3.bf16.msra.mxu1 %v1034_v43  ;;  %947 = vmatprep.subr.bf16.mxu0 %v1035_v44 }
  0x4d   :  { %969 = vmatprep.subr.bf16.mxu1 %v1036_v45  ;;  %718 = vmatprep.mubr.bf16.mxu0 %v834_v11 }
  0x4e   :  { %759 = vmatprep.mubr.bf16.mxu1 %v836_v15 }
  0x4f   :  { %948 = vmatpush3.bf16.msra.mxu0 %v1037_v46 }
  0x50   :  { %970 = vmatpush3.bf16.msra.mxu1 %v1038_v47  ;;  %949 = vmatprep.subr.bf16.mxu0 %v1039_v48 }
  0x51   :  { %971 = vmatprep.subr.bf16.mxu1 %v1040_v49 }
  0x53   :  { %950 = vmatpush3.bf16.msra.mxu0 %v1041_v50 }
  0x54   :  { %972 = vmatpush3.bf16.msra.mxu1 %v1042_v51  ;;  %951 = vmatprep.subr.bf16.mxu0 %v1043_v52 }
  0x55   :  { %973 = vmatprep.subr.bf16.mxu1 %v1044_v53 }
  0x57   :  { %952 = vmatpush3.bf16.msra.mxu0 %v1045_v54 }
  0x58   :  { %974 = vmatpush3.bf16.msra.mxu1 %v1046_v55  ;;  %953 = vmatprep.subr.bf16.mxu0 %v1047_v56 }
  0x59   :  { %975 = vmatprep.subr.bf16.mxu1 %v1048_v57 }
  0x5b   :  { %954 = vmatpush3.bf16.msra.mxu0 %v1049_v58 }
  0x5c   :  { %976 = vmatpush3.bf16.msra.mxu1 %v1050_v59  ;;  %955 = vmatprep.subr.bf16.mxu0 %v1051_v60 }
  0x5d   :  { %977 = vmatprep.subr.bf16.mxu1 %v1052_v61 }
  0x5f   :  { %956 = vmatpush3.bf16.msra.mxu0 %v1053_v62 }
  0x60   :  { %978 = vmatpush3.bf16.msra.mxu1 %v1054_v63  ;;  %957 = vmatprep.subr.bf16.mxu0 %v1055_v0 }
  0x61   :  { %979 = vmatprep.subr.bf16.mxu1 %v1056_v1 }
  0x63   :  { %958 = vmatpush3.bf16.msra.mxu0 %v1057_v2 }
  0x64   :  { %980 = vmatpush3.bf16.msra.mxu1 %v1058_v3  ;;  %959 = vmatprep.subr.bf16.mxu0 %v1059_v4 }
  0x65   :  { %981 = vmatprep.subr.bf16.mxu1 %v1060_v5 }
  0x67   :  { %960 = vmatpush3.bf16.msra.mxu0 %v1061_v6 }
  0x68   :  { %982 = vmatpush3.bf16.msra.mxu1 %v1062_v7 }
  0x6a   :  { %719 = vmatmul.mubr.bf16.vlgmr.msra.gmra.mrb[4].mxu0 %v833_v10 }
  0x6b   :  { %760 = vmatmul.mubr.bf16.vlgmr.msra.gmra.mrb[4].mxu1 %v835_v14 }
 0x11d   :  { %v917_v16 = vpop.f32.mrb[0].mxu0 }
 0x11e   :  { %v939_v17 = vpop.f32.mrb[0].mxu1  ;;  %v918_v18 = vpop.f32.mrb[1].mxu0 }
 0x11f   :  { %v919_v19 = vadd.f32 %v918_v18, %v917_v16  ;;  %v940_v20 = vpop.f32.mrb[1].mxu1  ;;  %v920_v21 = vpop.f32.mrb[2].mxu0 }
 0x120   :  { %v941_v22 = vadd.f32 %v940_v20, %v939_v17  ;;  %v942_v23 = vpop.f32.mrb[2].mxu1  ;;  %v921_v24 = vpop.f32.mrb[3].mxu0 }
 0x121   :  { %v922_v25 = vadd.f32 %v921_v24, %v920_v21  ;;  %v943_v26 = vpop.f32.mrb[3].mxu1 }
 0x122   :  { %v680_v27 = vadd.f32 %v941_v22, %v919_v19  ;;  %v944_v28 = vadd.f32 %v943_v26, %v942_v23 }
 0x124   :  { %v683_v29 = vadd.f32 %v944_v28, %v922_v25 }
 0x13d   :  { %v961_v31 = vpop.f32.mrb[4].mxu0 }
 0x13e   :  { %v983_v32 = vpop.f32.mrb[4].mxu1  ;;  %v962_v33 = vpop.f32.mrb[5].mxu0 }
 0x13f   :  { %v963_v35 = vadd.f32 %v962_v33, %v961_v31  ;;  %v984_v36 = vpop.f32.mrb[5].mxu1  ;;  %v964_v37 = vpop.f32.mrb[6].mxu0 }
 0x140   :  { %v985_v38 = vadd.f32 %v984_v36, %v983_v32  ;;  %v986_v39 = vpop.f32.mrb[6].mxu1  ;;  %v965_v40 = vpop.f32.mrb[7].mxu0 }
 0x141   :  { %v721_v41 = vadd.f32 %v963_v35, %v680_v27  ;;  %v966_v42 = vadd.f32 %v965_v40, %v964_v37  ;;  %v987_v43 = vpop.f32.mrb[7].mxu1 }
 0x142   :  { %v988_v44 = vadd.f32 %v987_v43, %v986_v39 }
 0x143   :  { %v724_v45 = vadd.f32 %v966_v42, %v683_v29  ;;  %v762_v46 = vadd.f32 %v985_v38, %v721_v41 }
 0x145   :  { %v773_v47 = vsel %vm772_vm0, %v762_v46, -inf  ;;  %768 = vst [vmem:[#allocation7] sm:$0xff] %v762_v46  ;;  %v765_v48 = vadd.f32 %v988_v44, %v724_v45 }
 0x146   :  { %775 = vmax.xlane.f32.xlu0 %v773_v47 }
 0x147   :  { %769 = vst [vmem:[#allocation7 + $0x8] sm:$0xff] %v765_v48  ;;  %v774_v49 = vsel %vm772_vm0, %v765_v48, -inf }
 0x14a   :  { %777 = vmax.xlane.f32.xlu0 %v774_v49 }
 0x1d3   :  { %v776_v50 = vpop.xlane.xlu0 %775 }
 0x1d4   :  { %v779_v51 = vsub.f32 %v773_v47, %v776_v50 }
 0x1d6   :  { %v781_v52 = vmul.f32 1.442695, %v779_v51 }
 0x1d7   :  { %v778_v53 = vpop.xlane.xlu0 %777 }
 0x1d8   :  { %1063 = vpow2.f32 %v781_v52  ;;  %v780_v54 = vsub.f32 %v774_v49, %v778_v53 }
 0x1da   :  { %v783_v55 = vmul.f32 1.442695, %v780_v54 }
 0x1dc   :  { %1065 = vpow2.f32 %v783_v55 }
 0x1e2   :  { %v1064_v56 = vpop.eup %1063 }
 0x1e3   :  { %785 = vadd.xlane.f32.xlu1 %v1064_v56 }
 0x1e6   :  { %v1066_v57 = vpop.eup %1065 }
 0x1e7   :  { %787 = vadd.xlane.f32.xlu1 %v1066_v57 }
 0x1e8   :  { %1126 = shalt.err (!%p1123_p6)
}
 0x1e9   :  { %s1127_s16 = scalar_lea.hbm %s1253_s2, 256 }
 0x1ea   :  { %p1128_p7 = scmp.ne.s32.totalorder %s1253_s2, %s1127_s16  ;;  %p1131_p8 = scmp.lt.u32.totalorder %s1127_s16, %s1253_s2 }
 0x1ec   :  { %p1133_p9 = pnand %p1131_p8, %p1128_p7 }
 0x1ee   :  { %1136 = shalt.err (!%p1133_p9)
}
 0x1ef   :  { %s1174_s21 = smov 128   ;;  %s1175_s22 = smov 8  }
 0x1f0   :  { %806 = dma.vmem_to_hbm [thread:$0]  %s801_s12, 256, %s1253_s2, [#allocation4], %s1174_s21, %s1174_s21, %s1175_s22  }
 0x1f1   :  { %s1176_s25 = smov [#allocation8]  }
 0x1f2   :  { %s812_s26 = sshll.u32 %s1176_s25, 4  ;;  %s813_s26 = int_to_ptr.vmem [resolvable:$true] %s812_s26 }
 0x1f3   :  { %s1137_s27 = scalar_lea.vmem %s813_s26, 256  ;;  %p1142_p11 = scmp.lt.s32.totalorder %s813_s26, %s813_s26 }
 0x1f4   :  { %p1138_p10 = scmp.ne.s32.totalorder %s813_s26, %s1137_s27  ;;  %p1143_p12 = scmp.lt.s32.totalorder %s1137_s27, %s1137_s27 }
 0x1f6   :  { %p1144_p13 = por %p1143_p12, %p1142_p11 }
 0x1f8   :  { %p1145_p0 = pnand %p1144_p13, %p1138_p10 }
 0x270   :  { %v786_v58 = vpop.xlane.xlu1 %785 }
 0x271   :  { %1067 = vrcp.f32 %v786_v58 }
 0x274   :  { %v788_v59 = vpop.xlane.xlu1 %787 }
 0x275   :  { %1069 = vrcp.f32 %v788_v59 }
 0x27b   :  { %v1068_v60 = vpop.eup %1067 }
 0x27c   :  { %v791_v61 = vmul.f32 %v1068_v60, %v1064_v56 }
 0x27e   :  { %793 = vst [vmem:[#allocation8] sm:$0xff] %v791_v61 }
 0x27f   :  { %v1070_v62 = vpop.eup %1069 }
 0x280   :  { %v792_v63 = vmul.f32 %v1070_v62, %v1066_v57 }
 0x282   :  { %794 = vst [vmem:[#allocation8 + $0x8] sm:$0xff] %v792_v63 }
 0x283   :  { %1148 = shalt.err (!%p1145_p0)
}
 0x284   :  { %s1149_s29 = scalar_lea.hbm %s1254_s3, 256 }
 0x285   :  { %p1150_p1 = scmp.ne.s32.totalorder %s1254_s3, %s1149_s29  ;;  %p1153_p2 = scmp.lt.u32.totalorder %s1149_s29, %s1254_s3 }
 0x287   :  { %p1155_p3 = pnand %p1153_p2, %p1150_p1 }
 0x289   :  { %1158 = shalt.err (!%p1155_p3)
}
 0x28a   :  { %818 = dma.vmem_to_hbm [thread:$0]  %s813_s26, 256, %s1254_s3, [#allocation9], %s1174_s21, %s1174_s21, %s1175_s22  }
 0x28b   :  { %1163 = dma.done.wait [#allocation4], 256  }
 0x28c   :  { %1164 = vsyncadd [#allocation4], 4294967040 }
 0x28d   :  { %1165 = dma.done.wait [#allocation9], 256  }
 0x28e   :  { %1166 = vsyncadd [#allocation9], 4294967040 }
 0x28f   :  { %825 = vsyncpa [#allocation3], 1 }
 0x290   :  { %826 = vsyncpa [#allocation6], 1 }
 0x291   :  { %827 = vsyncpa [#allocation4], 1 }
 0x292   :  { %828 = vsyncpa [#allocation9], 1 }

</bundles_post_ra>
